<compile_context>
chip_gen: v7x
topology: tpu7x:2x2x1
jax: 0.10.0
libtpu: 0.0.40
codegen_flags: <defaults>
</compile_context>

<pallas_src>
import math

import jax
import jax.numpy as jnp
from jax.experimental import pallas as pl
from jax.experimental.pallas import tpu as pltpu


# ----------------------------- kernels ------------------------------------ #

def fc_eval_kernel(x_ref, w_ref, b_ref, o_ref):
    """y = x @ W + b   (dropout is identity in eval mode)."""
    acc = jnp.dot(x_ref[...], w_ref[...], preferred_element_type=jnp.float32)
    o_ref[...] = (acc + b_ref[...]).astype(o_ref.dtype)


def fc_train_kernel(x_ref, w_ref, b_ref, mask_ref, o_ref):
    """y = (x @ W + b) * mask, mask in {0, 1/(1-p)} precomputed in f32."""
    acc = jnp.dot(x_ref[...], w_ref[...], preferred_element_type=jnp.float32)
    o_ref[...] = ((acc + b_ref[...]) * mask_ref[...]).astype(o_ref.dtype)


# ----------------------------- helpers ------------------------------------- #

def _round_up(x, m):
    return ((x + m - 1) // m) * m


def _spec(block_shape, index_map, single_buffered=False):
    """BlockSpec; grid-invariant operands request a single VMEM buffer."""
    if single_buffered:
        try:
            return pl.BlockSpec(block_shape, index_map,
                                pipeline_mode=pl.Buffered(1))
        except Exception:  # older Pallas without pipeline_mode / Buffered
            pass
    return pl.BlockSpec(block_shape, index_map)


def _vmem_budget_bytes():
    """Shape-aware VMEM budget: ~3/4 of physical capacity when queryable."""
    try:
        cap = pltpu.get_tpu_info().vmem_capacity_bytes
        return int(cap * 3 // 4)
    except Exception:
        return 48 * 1024 * 1024  # conservative: fits v7x's 64 MiB / TensorCore


def _choose_tiling(m, emb_len, d_model, with_mask, budget):
    in_b, acc_b = 2, 4  # bf16 streamed operands; f32 bias / out / mask

    def vmem_usage(tile_m, tile_n, n_tiles):
        w_bufs = 1 if n_tiles == 1 else 2          # single-buffer invariant W
        u = emb_len * tile_n * in_b * w_bufs       # weight slice
        u += tile_n * acc_b * w_bufs               # bias slice
        u += tile_m * emb_len * in_b * 2           # x tile (double buffered)
        u += tile_m * tile_n * acc_b * 2           # out tile (double buffered)
        if with_mask:
            u += tile_m * tile_n * acc_b * 2       # dropout mask tile
        return u

    # Row tile: 512 (multiple of 256 -> full 2x256 MXU passes) for large M,
    # else round M up to the bf16 sublane pack of 16.
    tile_m = 512 if m >= 512 else _round_up(m, 16)
    tile_n, n_tiles = d_model, 1

    # Shrink the weight slice (multiples of 256 lanes) until it fits VMEM.
    while vmem_usage(tile_m, tile_n, n_tiles) > budget and tile_n > 256:
        tile_n = max(256, _round_up(pl.cdiv(tile_n, 2), 256))
        n_tiles = pl.cdiv(d_model, tile_n)
    # Still too big (very large emb_len): shrink the row tile as well.
    while vmem_usage(tile_m, tile_n, n_tiles) > budget and tile_m > 16:
        tile_m = max(16, tile_m // 2)
    # TODO(synk): tile emb_len (K) with an f32 accumulator if a single
    # (emb_len x 256) weight slice still cannot fit the VMEM budget.

    m_tiles = pl.cdiv(m, tile_m)
    # A 1-step grid cannot pipeline anything: split d_model (>=128-lane
    # slices) so the next W-slice DMA overlaps the current matmul.
    if m_tiles == 1 and n_tiles == 1 and d_model >= 256:
        tile_n = max(128, _round_up(pl.cdiv(d_model, 2), 128))
        n_tiles = pl.cdiv(d_model, tile_n)

    return tile_m, tile_n, m_tiles, n_tiles, vmem_usage(tile_m, tile_n, n_tiles)


# ----------------------------- wrapper ------------------------------------- #

def fc_block(x, w, b, *, p=0.1, training=False, rng_key=None):
    """Pallas FCBlock.forward: dropout(x @ w + b, p).

    x: (..., emb_len);  w: (emb_len, d_model) (= torch weight transposed);
    b: (d_model,).  Returns (..., d_model) in x.dtype.
    """
    emb_len, d_model = w.shape
    lead = x.shape[:-1]
    m = math.prod(lead)
    out_dtype = x.dtype

    # bf16 streamed operands, f32 accumulation / bias / store.
    x_lp = x.reshape(m, emb_len).astype(jnp.bfloat16)
    w_lp = w.astype(jnp.bfloat16)
    b2d = b.reshape(1, d_model).astype(jnp.float32)

    apply_dropout = bool(training) and p > 0.0
    budget = _vmem_budget_bytes()
    tile_m, tile_n, m_tiles, n_tiles, vmem_est = _choose_tiling(
        m, emb_len, d_model, apply_dropout, budget)

    # N axis outermost: W slice (block index (0, j)) is constant across the
    # whole inner M sweep -> fetched from HBM exactly once.
    grid = (n_tiles, m_tiles)
    w_invariant = n_tiles == 1

    x_spec = _spec((tile_m, emb_len), lambda j, i: (i, 0),
                   single_buffered=(m_tiles == 1))
    w_spec = _spec((emb_len, tile_n), lambda j, i: (0, j),
                   single_buffered=w_invariant)
    b_spec = _spec((1, tile_n), lambda j, i: (0, j),
                   single_buffered=w_invariant)
    o_spec = pl.BlockSpec((tile_m, tile_n), lambda j, i: (i, j))

    # Honest cost: bf16 operand bytes, real m, x restreamed once per N tile.
    x_restream = n_tiles if m_tiles > 1 else 1
    cost = pl.CostEstimate(
        flops=2 * m * emb_len * d_model,
        transcendentals=0,
        bytes_accessed=(2 * m * emb_len * x_restream        # x  (bf16)
                        + 2 * emb_len * d_model             # W  (bf16), once
                        + 4 * d_model                       # bias (f32)
                        + 4 * m * d_model                   # out  (f32)
                        + (4 * m * d_model if apply_dropout else 0)),
    )
    compiler_params = pltpu.CompilerParams(
        dimension_semantics=("parallel", "parallel"),
        vmem_limit_bytes=int(min(max(vmem_est + (16 << 20), 32 << 20),
                                 max(budget, 32 << 20))),
    )
    out_shape = jax.ShapeDtypeStruct((m, d_model), out_dtype)

    if not apply_dropout:
        out = pl.pallas_call(
            fc_eval_kernel,
            out_shape=out_shape,
            grid=grid,
            in_specs=[x_spec, w_spec, b_spec],
            out_specs=o_spec,
            compiler_params=compiler_params,
            cost_estimate=cost,
        )(x_lp, w_lp, b2d)
    else:
        if rng_key is None:
            rng_key = jax.random.PRNGKey(0)
        keep = jax.random.bernoulli(rng_key, 1.0 - p, (m, d_model))
        mask = keep.astype(jnp.float32) * jnp.float32(1.0 / (1.0 - p))
        mask_spec = pl.BlockSpec((tile_m, tile_n), lambda j, i: (i, j))
        out = pl.pallas_call(
            fc_train_kernel,
            out_shape=out_shape,
            grid=grid,
            in_specs=[x_spec, w_spec, b_spec, mask_spec],
            out_specs=o_spec,
            compiler_params=compiler_params,
            cost_estimate=cost,
        )(x_lp, w_lp, b2d, mask)

    return out.reshape(*lead, d_model)


# ------------------------------ main --------------------------------------- #

if __name__ == "__main__":
    # Small shapes consistent with FCBlock: x has trailing dim emb_len.
    batch, seq = 2, 8
    emb_len, d_model = 32, 128
    p_drop = 0.1

    key = jax.random.PRNGKey(0)
    kx, kw, kb, kd = jax.random.split(key, 4)

    x = jax.random.normal(kx, (batch, seq, emb_len), dtype=jnp.float32)
    # Parameter init mimicking nn.Linear's uniform(-1/sqrt(k), 1/sqrt(k)).
    bound = 1.0 / (emb_len ** 0.5)
    w = jax.random.uniform(kw, (emb_len, d_model), minval=-bound, maxval=bound,
                           dtype=jnp.float32)
    b = jax.random.uniform(kb, (d_model,), minval=-bound, maxval=bound,
                           dtype=jnp.float32)

    # Reference with the same bf16 operand rounding the kernel uses
    # (f32 accumulation), so the comparison isolates kernel correctness.
    x_bf = x.astype(jnp.bfloat16).astype(jnp.float32)
    w_bf = w.astype(jnp.bfloat16).astype(jnp.float32)
    y_ref = x_bf @ w_bf + b

    # Eval-mode forward (dropout = identity).
    y = fc_block(x, w, b, p=p_drop, training=False)
    jax.block_until_ready(y)
    assert y.shape == (batch, seq, d_model)
    assert jnp.allclose(y, y_ref, atol=1e-2, rtol=1e-2), "eval-mode mismatch"

    # Train-mode forward (dropout applied). The random stream differs from
    # PyTorch's, so check structural properties instead of exact values.
    y_tr = fc_block(x, w, b, p=p_drop, training=True, rng_key=kd)
    jax.block_until_ready(y_tr)
    assert y_tr.shape == (batch, seq, d_model)
    zero_frac = float(jnp.mean(y_tr == 0.0))
    assert 0.0 < zero_frac < 0.5, f"unexpected dropout zero fraction {zero_frac}"
    kept = y_tr != 0.0
    assert jnp.allclose(jnp.where(kept, y_tr, 0.0),
                        jnp.where(kept, y_ref / (1.0 - p_drop), 0.0),
                        atol=1e-2, rtol=1e-2), "train-mode kept values mismatch"

    print("KERNEL_OK")
</pallas_src>

<mosaic_0001>
module attributes {stable_mosaic.version = 11 : i64} {
  func.func @fc_eval_kernel(%arg0: i32, %arg1: i32, %arg2: memref<16x32xbf16, #tpu.memory_space<vmem>>, %arg3: memref<32x128xbf16, #tpu.memory_space<vmem>>, %arg4: memref<1x128xf32, #tpu.memory_space<vmem>>, %arg5: memref<16x128xf32, #tpu.memory_space<vmem>>) attributes {dimension_semantics = [#tpu.dimension_semantics<parallel>, #tpu.dimension_semantics<parallel>], iteration_bounds = array<i64: 1, 1>, scalar_prefetch = 0 : i64, scratch_operands = 0 : i64, tpu.core_type = #tpu.core_type<tc>, window_params = [{pipeline_mode = #tpu.pipeline_mode<synchronous>, transform_indices = @transform_0, window_bounds = array<i64: 16, 32>}, {pipeline_mode = #tpu.pipeline_mode<synchronous>, transform_indices = @transform_1, window_bounds = array<i64: 32, 128>}, {pipeline_mode = #tpu.pipeline_mode<synchronous>, transform_indices = @transform_2, window_bounds = array<i64: 1, 128>}, {transform_indices = @transform_3, window_bounds = array<i64: 16, 128>}]} {
    %c0 = arith.constant 0 : index
    %c0_0 = arith.constant 0 : index
    %0 = vector.load %arg2[%c0, %c0_0] : memref<16x32xbf16, #tpu.memory_space<vmem>>, vector<16x32xbf16>
    %c0_1 = arith.constant 0 : index
    %c0_2 = arith.constant 0 : index
    %1 = vector.load %arg3[%c0_1, %c0_2] : memref<32x128xbf16, #tpu.memory_space<vmem>>, vector<32x128xbf16>
    %cst = arith.constant dense<0.000000e+00> : vector<16x128xf32>
    %2 = tpu.matmul %0, %1, %cst {dimension_numbers = #tpu.dot_dimension_numbers<[1], [0], [0], [1], [0, 0, 1, 1], [], []>} : vector<16x32xbf16>, vector<32x128xbf16>, vector<16x128xf32> -> vector<16x128xf32>
    %c0_3 = arith.constant 0 : index
    %c0_4 = arith.constant 0 : index
    %3 = vector.load %arg4[%c0_3, %c0_4] : memref<1x128xf32, #tpu.memory_space<vmem>>, vector<1x128xf32>
    %4 = vector.broadcast %3 : vector<1x128xf32> to vector<16x128xf32>
    %5 = arith.addf %2, %4 : vector<16x128xf32>
    %c0_5 = arith.constant 0 : index
    %c0_6 = arith.constant 0 : index
    %6 = vector.load %arg5[%c0_5, %c0_6] : memref<16x128xf32, #tpu.memory_space<vmem>>, vector<16x128xf32>
    tpu.vector_store %arg5[%c0_5, %c0_6], %5 {strides = array<i32>} : memref<16x128xf32, #tpu.memory_space<vmem>>, vector<16x128xf32>,
    return
  }
  func.func @transform_0(%arg0: i32, %arg1: i32) -> (i32, i32) {
    %c0_i32 = arith.constant 0 : i32
    %c0_i32_0 = arith.constant 0 : i32
    return %arg1, %c0_i32 : i32, i32
  }
  func.func @transform_1(%arg0: i32, %arg1: i32) -> (i32, i32) {
    %c0_i32 = arith.constant 0 : i32
    %c0_i32_0 = arith.constant 0 : i32
    return %c0_i32, %arg0 : i32, i32
  }
  func.func @transform_2(%arg0: i32, %arg1: i32) -> (i32, i32) {
    %c0_i32 = arith.constant 0 : i32
    %c0_i32_0 = arith.constant 0 : i32
    return %c0_i32, %arg0 : i32, i32
  }
  func.func @transform_3(%arg0: i32, %arg1: i32) -> (i32, i32) {
    %c0_i32 = arith.constant 0 : i32
    return %arg1, %arg0 : i32, i32
  }
}

</mosaic_0001>

<bundles_post_ra>
// kernel: tpu_custom_call.1
= control target key start
LH: loop header
LB: loop body
LE: loop exit
PB: predicated region body
PF: predicated region fallthrough
CT: control target
= control target key end

     0   :  { %8 = vsyncpa [#allocation3], 0  ;;  %s307_s0 = inlined_call_operand.hbm [shape: bf16[16,32], index: 0, kind: input, shape index: {}]   ;;  %s308_s1 = inlined_call_operand.hbm [shape: bf16[32,128], index: 1, kind: input, shape index: {}]   ;;  %s309_s2 = inlined_call_operand.vmem [shape: f32[1,128], index: 2, kind: input, shape index: {}]   ;;  %s310_s3 = inlined_call_operand.hbm [shape: f32[16,128], index: 3, kind: output, shape index: {}]  }
   0x1   :  { %9 = vsyncpa [#allocation6], 0 }
   0x2   :  { %10 = vsyncpa [#allocation4], 0  ;;  %s239_s12 = smov [#allocation2]   ;;  %s167_s16 = scalar_lea.hbm %s307_s0, 128 }
   0x3   :  { %s16_s13 = sshll.u32 %s239_s12, 4  ;;  %p168_p0 = scmp.ne.s32.totalorder %s307_s0, %s167_s16  ;;  %s17_s13 = int_to_ptr.vmem [resolvable:$true] %s16_s13 }
   0x4   :  { %p171_p1 = scmp.lt.u32.totalorder %s167_s16, %s307_s0 }
   0x6   :  { %p173_p2 = pnand %p171_p1, %p168_p0 }
   0x8   :  { %176 = shalt.err (!%p173_p2)
}
   0x9   :  { %s177_s21 = scalar_lea.vmem %s17_s13, 128  ;;  %p182_p4 = scmp.lt.s32.totalorder %s17_s13, %s17_s13 }
   0xa   :  { %p178_p3 = scmp.ne.s32.totalorder %s17_s13, %s177_s21  ;;  %p183_p5 = scmp.lt.s32.totalorder %s177_s21, %s177_s21 }
   0xc   :  { %p184_p6 = por %p183_p5, %p182_p4 }
   0xe   :  { %p185_p7 = pnand %p184_p6, %p178_p3 }
  0x10   :  { %188 = shalt.err (!%p185_p7)
}
  0x11   :  { %s240_s22 = smov 64   ;;  %s241_s23 = smov 4  }
  0x12   :  { %22 = dma.hbm_to_vmem [thread:$0]  %s307_s0, 128, %s17_s13, [#allocation3], %s240_s22, %s240_s22, %s241_s23  }
  0x13   :  { %s242_s26 = smov [#allocation5]   ;;  %s189_s30 = scalar_lea.hbm %s308_s1, 256 }
  0x14   :  { %s28_s27 = sshll.u32 %s242_s26, 4  ;;  %p190_p8 = scmp.ne.s32.totalorder %s308_s1, %s189_s30  ;;  %s29_s27 = int_to_ptr.vmem [resolvable:$true] %s28_s27 }
  0x15   :  { %p193_p9 = scmp.lt.u32.totalorder %s189_s30, %s308_s1 }
  0x17   :  { %p195_p10 = pnand %p193_p9, %p190_p8 }
  0x19   :  { %198 = shalt.err (!%p195_p10)
}
  0x1a   :  { %s199_s8 = scalar_lea.vmem %s29_s27, 256  ;;  %p204_p12 = scmp.lt.s32.totalorder %s29_s27, %s29_s27 }
  0x1b   :  { %p200_p11 = scmp.ne.s32.totalorder %s29_s27, %s199_s8  ;;  %p205_p13 = scmp.lt.s32.totalorder %s199_s8, %s199_s8 }
  0x1d   :  { %p206_p0 = por %p205_p13, %p204_p12 }
  0x1f   :  { %p207_p1 = pnand %p206_p0, %p200_p11 }
  0x21   :  { %210 = shalt.err (!%p207_p1)
}
  0x22   :  { %34 = dma.hbm_to_vmem [thread:$0]  %s308_s1, 256, %s29_s27, [#allocation6], %s240_s22, %s240_s22, %s241_s23  }
  0x23   :  { %233 = dma.done.wait [#allocation3], 128  }
  0x24   :  { %234 = vsyncadd [#allocation3], 4294967168 }
  0x25   :  { %235 = dma.done.wait [#allocation6], 256  }
  0x26   :  { %236 = vsyncadd [#allocation6], 4294967040  ;;  %v243_v0 = vmov 0.0   ;;  %vm244_vm0 = vmmov 0   ;;  %v164_v1 = vld [vmem:[#allocation5] sm:$0xff]   ;;  %v165_v2 = vld [vmem:[#allocation5 + $0x8] sm:$0xff]  }
  0x27   :  { %147 = vmatprep.subr.bf16.mxu0 %v243_v0  ;;  %151 = vmatprep.mubr.msk.bf16.mxu0 %vm244_vm0, %v243_v0  ;;  %v166_v3 = vld [vmem:[#allocation2] sm:$0xff]   ;;  %vm74_vm1 = vcmask 261120   ;;  %s245_s1 = smov [#allocation7]  }
  0x28   :  { %148 = vmatpush3.bf16.msra.mxu0 %v164_v1  ;;  %v139_v4 = vld [vmem:[%s309_s2] ss:$0 sm:$0xff]  ;;  %s126_s12 = sshll.u32 %s245_s1, 4  ;;  %s127_s12 = int_to_ptr.vmem [resolvable:$true] %s126_s12 }
  0x29   :  { %149 = vmatprep.subr.bf16.mxu0 %v243_v0  ;;  %s211_s13 = scalar_lea.vmem %s127_s12, 256  ;;  %p216_p3 = scmp.lt.s32.totalorder %s127_s12, %s127_s12 }
  0x2a   :  { %p212_p2 = scmp.ne.s32.totalorder %s127_s12, %s211_s13  ;;  %p217_p4 = scmp.lt.s32.totalorder %s211_s13, %s211_s13 }
  0x2c   :  { %150 = vmatpush3.bf16.msra.mxu0 %v165_v2  ;;  %p218_p5 = por %p217_p4, %p216_p3 }
  0x2e   :  { %p219_p6 = pnand %p218_p5, %p212_p2 }
  0x2f   :  { %152 = vmatmul.mubr.msk.bf16.vlgmr.msra.gmra.mrb[0].mxu0 %vm74_vm1, %v166_v3 }
 0x102   :  { %v112_v5 = vpop.f32.mrb[0].mxu0 }
 0x103   :  { %v113_v6 = vadd.f32 %v139_v4, %v112_v5  ;;  %v153_v7 = vpop.f32.mrb[1].mxu0 }
 0x104   :  { %v115_v8 = vpop.f32.mrb[2].mxu0 }
 0x105   :  { %119 = vst [vmem:[#allocation7] sm:$0xff] %v113_v6  ;;  %v116_v9 = vadd.f32 %v139_v4, %v115_v8  ;;  %v154_v10 = vpop.f32.mrb[3].mxu0 }
 0x107   :  { %120 = vst [vmem:[#allocation7 + $0x8] sm:$0xff] %v116_v9 }
 0x108   :  { %222 = shalt.err (!%p219_p6)
}
 0x109   :  { %s223_s15 = scalar_lea.hbm %s310_s3, 256 }
 0x10a   :  { %p224_p7 = scmp.ne.s32.totalorder %s310_s3, %s223_s15  ;;  %p227_p8 = scmp.lt.u32.totalorder %s223_s15, %s310_s3 }
 0x10c   :  { %p229_p9 = pnand %p227_p8, %p224_p7 }
 0x10e   :  { %232 = shalt.err (!%p229_p9)
}
 0x10f   :  { %s246_s20 = smov 128   ;;  %s247_s21 = smov 8  }
 0x110   :  { %132 = dma.vmem_to_hbm [thread:$0]  %s127_s12, 256, %s310_s3, [#allocation4], %s246_s20, %s246_s20, %s247_s21  }
 0x111   :  { %237 = dma.done.wait [#allocation4], 256  }
 0x112   :  { %238 = vsyncadd [#allocation4], 4294967040 }
 0x113   :  { %136 = vsyncpa [#allocation3], 1 }
 0x114   :  { %137 = vsyncpa [#allocation6], 1 }
 0x115   :  { %138 = vsyncpa [#allocation4], 1 }

</bundles_post_ra>
